<compile_context>
chip_gen: v6e
topology: v6e:2x2x1
jax: 0.10.0
libtpu: 0.0.40
codegen_flags: <defaults>
</compile_context>

<pallas_src>
import functools

import jax
import jax.numpy as jnp
from jax.experimental import pallas as pl
from jax.experimental.pallas import tpu as pltpu


def _round_up(x, m):
    return ((x + m - 1) // m) * m


def _vmem_capacity_bytes():
    """Physical VMEM per TensorCore; conservative fallback if query fails."""
    try:
        info = pltpu.get_tpu_info()
        cap = getattr(info, "vmem_capacity_bytes", None)
        if cap:
            return int(cap)
    except Exception:
        pass
    return 64 * 1024 * 1024  # v7x per-TC VMEM (smallest of the three gens)


def _norm_apply(x, mean, rstd, w, b, l2, out_dtype):
    """InstanceNorm apply + optional per-pixel channel L2 + affine.

    x: (C, T) f32; mean/rstd/w/b: (C, 1) f32.  Returns (C, T) in out_dtype.
    """
    if l2:
        t = (x - mean) * rstd                       # streamed, feeds the reduce
        ss = jnp.sum(t * t, axis=0, keepdims=True)  # (1, T) per-pixel ||y||^2
        # max(sqrt(ss), 1e-12) == sqrt(max(ss, 1e-24)) -> one EUP rsqrt, no div.
        rln = jax.lax.rsqrt(jnp.maximum(ss, 1e-24))
        # Recompute (x - mean)*rstd in the epilogue instead of reusing `t`
        # (keeps the full-tile temporary out of VMEM).
        return ((x - mean) * (rstd * w) * rln + b).astype(out_dtype)
    # l2=False: fold the affine into per-channel scale/shift (1 mul + 1 add).
    scale = rstd * w
    shift = b - mean * scale
    return (x * scale + shift).astype(out_dtype)


# ----------------------------- fused single pass -----------------------------

def _dn2_fused_kernel(x_ref, w_ref, b_ref, o_ref, *, inv_n, eps, l2):
    """Whole-image block (1, C, HW): channels on sublanes, HW on lanes."""
    x = x_ref[0].astype(jnp.float32)                     # (C, HW), cast in-kernel
    s1 = jnp.sum(x, axis=1, keepdims=True)               # (C, 1)
    s2 = jnp.sum(x * x, axis=1, keepdims=True)           # (C, 1)
    mean = s1 * inv_n
    var = jnp.maximum(s2 * inv_n - mean * mean, 0.0)     # clamp roundoff
    rstd = jax.lax.rsqrt(var + eps)
    o_ref[0] = _norm_apply(x, mean, rstd, w_ref[...], b_ref[...], l2, o_ref.dtype)


# ----------------------------- two-pass (tiled) ------------------------------

def _dn2_stats_kernel(x_ref, mean_ref, rstd_ref, s1_ref, s2_ref, *,
                      inv_n, eps, hw, tile, need_mask):
    """Pass 1: accumulate per-channel sum / sum-of-squares over HW tiles."""
    t = pl.program_id(1)
    x = x_ref[0].astype(jnp.float32)                     # (C, T)
    if need_mask:
        lane = jax.lax.broadcasted_iota(jnp.int32, x.shape, 1)
        x = jnp.where(lane + t * tile < hw, x, 0.0)      # zero out OOB lanes

    @pl.when(t == 0)
    def _():
        s1_ref[...] = jnp.zeros_like(s1_ref)
        s2_ref[...] = jnp.zeros_like(s2_ref)

    s1_ref[...] += jnp.sum(x, axis=1, keepdims=True)
    s2_ref[...] += jnp.sum(x * x, axis=1, keepdims=True)

    @pl.when(t == pl.num_programs(1) - 1)
    def _():
        mean = s1_ref[...] * inv_n
        var = jnp.maximum(s2_ref[...] * inv_n - mean * mean, 0.0)
        mean_ref[0] = mean
        rstd_ref[0] = jax.lax.rsqrt(var + eps)


def _dn2_apply_kernel(x_ref, mean_ref, rstd_ref, w_ref, b_ref, o_ref, *, l2):
    """Pass 2: apply IN stats + per-pixel channel L2 + affine, tiled over HW."""
    x = x_ref[0].astype(jnp.float32)                     # (C, T)
    o_ref[0] = _norm_apply(x, mean_ref[0], rstd_ref[0],
                           w_ref[...], b_ref[...], l2, o_ref.dtype)


def _pick_hw_tile(C, HW):
    """Lane-dense HW tile: multiple of 128, ~2 MiB of f32, capped by HW."""
    target_bytes = 2 * 1024 * 1024
    t = max(512, (target_bytes // (4 * C)) // 128 * 128)
    t = min(t, max(128, (HW // 128) * 128))
    return max(t, 128)


# --------------------------------- wrapper -----------------------------------

def domain_norm2(x, weight, bias, *, l2=True, eps=1e-5, two_pass=None,
                 hw_tile=None):
    """x: (B, C, H, W); weight/bias broadcastable to (1, C, 1, 1). -> (B, C, H, W)."""
    B, C, H, W = x.shape
    HW = H * W
    out_dtype = x.dtype

    x3 = x.reshape(B, C, HW)                              # free reshape, native dtype
    w2 = jnp.reshape(weight, (C, 1)).astype(jnp.float32)  # tiny params
    b2 = jnp.reshape(bias, (C, 1)).astype(jnp.float32)

    vmem_limit = max(32 << 20, _vmem_capacity_bytes() - (16 << 20))
    in_bytes = C * HW * x3.dtype.itemsize
    out_bytes = C * HW * jnp.dtype(out_dtype).itemsize
    # double-buffered in/out blocks + ~3 full-size f32 temporaries in-kernel
    fused_footprint = 2 * (in_bytes + out_bytes) + 3 * C * HW * 4
    if two_pass is None:
        two_pass = fused_footprint > int(0.8 * vmem_limit)

    if not two_pass:
        out = pl.pallas_call(
            functools.partial(_dn2_fused_kernel, inv_n=1.0 / HW, eps=eps, l2=l2),
            out_shape=jax.ShapeDtypeStruct((B, C, HW), out_dtype),
            grid=(B,),
            in_specs=[
                pl.BlockSpec((1, C, HW), lambda b: (b, 0, 0)),
                pl.BlockSpec((C, 1), lambda b: (0, 0)),
                pl.BlockSpec((C, 1), lambda b: (0, 0)),
            ],
            out_specs=pl.BlockSpec((1, C, HW), lambda b: (b, 0, 0)),
            compiler_params=pltpu.CompilerParams(
                dimension_semantics=("parallel",),
                vmem_limit_bytes=vmem_limit),
            cost_estimate=pl.CostEstimate(
                flops=10 * B * C * HW,
                transcendentals=B * (C + (HW if l2 else 0)),
                bytes_accessed=B * (in_bytes + out_bytes)),
        )(x3, w2, b2)
        return out.reshape(B, C, H, W)

    # ---- two-pass HW-tiled pipeline (large frames / forced) ----
    T = hw_tile if hw_tile is not None else _pick_hw_tile(C, HW)
    n_tiles = pl.cdiv(HW, T)
    need_mask = (HW % T) != 0

    mean, rstd = pl.pallas_call(
        functools.partial(_dn2_stats_kernel, inv_n=1.0 / HW, eps=eps,
                          hw=HW, tile=T, need_mask=need_mask),
        out_shape=(jax.ShapeDtypeStruct((B, C, 1), jnp.float32),
                   jax.ShapeDtypeStruct((B, C, 1), jnp.float32)),
        grid=(B, n_tiles),
        in_specs=[pl.BlockSpec((1, C, T), lambda b, t: (b, 0, t))],
        out_specs=(pl.BlockSpec((1, C, 1), lambda b, t: (b, 0, 0)),
                   pl.BlockSpec((1, C, 1), lambda b, t: (b, 0, 0))),
        scratch_shapes=[pltpu.VMEM((C, 1), jnp.float32),
                        pltpu.VMEM((C, 1), jnp.float32)],
        compiler_params=pltpu.CompilerParams(
            dimension_semantics=("parallel", "arbitrary"),
            vmem_limit_bytes=vmem_limit),
        cost_estimate=pl.CostEstimate(
            flops=3 * B * C * HW, transcendentals=B * C,
            bytes_accessed=B * in_bytes),
    )(x3)

    out = pl.pallas_call(
        functools.partial(_dn2_apply_kernel, l2=l2),
        out_shape=jax.ShapeDtypeStruct((B, C, HW), out_dtype),
        grid=(B, n_tiles),
        in_specs=[
            pl.BlockSpec((1, C, T), lambda b, t: (b, 0, t)),
            pl.BlockSpec((1, C, 1), lambda b, t: (b, 0, 0)),
            pl.BlockSpec((1, C, 1), lambda b, t: (b, 0, 0)),
            pl.BlockSpec((C, 1), lambda b, t: (0, 0)),
            pl.BlockSpec((C, 1), lambda b, t: (0, 0)),
        ],
        out_specs=pl.BlockSpec((1, C, T), lambda b, t: (b, 0, t)),
        compiler_params=pltpu.CompilerParams(
            # both axes parallel: feeds both v7x TensorCores even at B == 1
            dimension_semantics=("parallel", "parallel"),
            vmem_limit_bytes=vmem_limit),
        cost_estimate=pl.CostEstimate(
            flops=8 * B * C * HW,
            transcendentals=(B * HW if l2 else 0),
            bytes_accessed=B * (in_bytes + out_bytes)),
    )(x3, mean, rstd, w2, b2)
    return out.reshape(B, C, H, W)


def domain_norm2_ref(x, weight, bias, l2=True, eps=1e-5):
    """Pure-JAX reference mirroring the PyTorch forward."""
    mean = jnp.mean(x, axis=(2, 3), keepdims=True)
    var = jnp.mean(jnp.square(x - mean), axis=(2, 3), keepdims=True)
    y = (x - mean) / jnp.sqrt(var + eps)
    if l2:
        nrm = jnp.sqrt(jnp.sum(y * y, axis=1, keepdims=True))
        y = y / jnp.maximum(nrm, 1e-12)
    return y * weight + bias


if __name__ == "__main__":
    key = jax.random.PRNGKey(0)
    kx, kw, kb, kx2 = jax.random.split(key, 4)

    # Case 1: aligned shapes, fused single-pass path (l2=True).
    B, C, H, W = 2, 32, 16, 16
    x = jax.random.normal(kx, (B, C, H, W), jnp.float32)
    weight = 1.0 + 0.1 * jax.random.normal(kw, (1, C, 1, 1), jnp.float32)
    bias = 0.05 * jax.random.normal(kb, (1, C, 1, 1), jnp.float32)
    ref1 = domain_norm2_ref(x, weight, bias, l2=True)

    out1 = jax.jit(functools.partial(domain_norm2, l2=True, two_pass=False))(
        x, weight, bias)
    jax.block_until_ready(out1)
    assert out1.shape == (B, C, H, W), out1.shape
    assert bool(jnp.all(jnp.isfinite(out1)))
    assert float(jnp.max(jnp.abs(out1 - ref1))) < 1e-3

    # Case 2: same inputs through the two-pass HW-tiled path (forced tiling).
    out2 = jax.jit(functools.partial(domain_norm2, l2=True, two_pass=True,
                                     hw_tile=128))(x, weight, bias)
    jax.block_until_ready(out2)
    assert float(jnp.max(jnp.abs(out2 - ref1))) < 1e-3

    # Case 3: awkward shapes (C % 8 != 0, HW % 128 != 0), l2=False, both paths.
    B2, C2, H2, W2 = 1, 5, 12, 20
    x2 = jax.random.normal(kx2, (B2, C2, H2, W2), jnp.float32)
    w2 = 1.0 + 0.1 * jax.random.normal(kw, (1, C2, 1, 1), jnp.float32)
    b2 = 0.05 * jax.random.normal(kb, (1, C2, 1, 1), jnp.float32)
    ref3 = domain_norm2_ref(x2, w2, b2, l2=False)

    out3 = jax.jit(functools.partial(domain_norm2, l2=False, two_pass=False))(
        x2, w2, b2)
    out4 = jax.jit(functools.partial(domain_norm2, l2=False, two_pass=True,
                                     hw_tile=128))(x2, w2, b2)
    jax.block_until_ready((out3, out4))
    assert float(jnp.max(jnp.abs(out3 - ref3))) < 1e-3
    assert float(jnp.max(jnp.abs(out4 - ref3))) < 1e-3

    print("KERNEL_OK")
</pallas_src>

<mosaic_0001>
module attributes {stable_mosaic.version = 11 : i64} {
  func.func @_dn2_fused_kernel(%arg0: i32, %arg1: memref<1x32x256xf32, #tpu.memory_space<vmem>>, %arg2: memref<32x1xf32, #tpu.memory_space<vmem>>, %arg3: memref<32x1xf32, #tpu.memory_space<vmem>>, %arg4: memref<1x32x256xf32, #tpu.memory_space<vmem>>) attributes {dimension_semantics = [#tpu.dimension_semantics<parallel>], iteration_bounds = array<i64: 2>, scalar_prefetch = 0 : i64, scratch_operands = 0 : i64, tpu.core_type = #tpu.core_type<tc>, window_params = [{transform_indices = @transform_0, window_bounds = array<i64: 1, 32, 256>}, {pipeline_mode = #tpu.pipeline_mode<synchronous>, transform_indices = @transform_1, window_bounds = array<i64: 32, 1>}, {pipeline_mode = #tpu.pipeline_mode<synchronous>, transform_indices = @transform_2, window_bounds = array<i64: 32, 1>}, {transform_indices = @transform_3, window_bounds = array<i64: 1, 32, 256>}]} {
    %c0 = arith.constant 0 : index
    %c0_0 = arith.constant 0 : index
    %c0_1 = arith.constant 0 : index
    %0 = vector.load %arg1[%c0, %c0_0, %c0_1] : memref<1x32x256xf32, #tpu.memory_space<vmem>>, vector<1x32x256xf32>
    %1 = vector.shape_cast %0 : vector<1x32x256xf32> to vector<32x256xf32>
    %cst = arith.constant dense<0.000000e+00> : vector<32xf32>
    %2 = vector.multi_reduction <add>, %1, %cst [1] : vector<32x256xf32> to vector<32xf32>
    %3 = vector.shape_cast %2 : vector<32xf32> to vector<32x1xf32>
    %4 = arith.mulf %1, %1 : vector<32x256xf32>
    %cst_2 = arith.constant dense<0.000000e+00> : vector<32xf32>
    %5 = vector.multi_reduction <add>, %4, %cst_2 [1] : vector<32x256xf32> to vector<32xf32>
    %6 = vector.shape_cast %5 : vector<32xf32> to vector<32x1xf32>
    %cst_3 = arith.constant 3.906250e-03 : f32
    %7 = vector.broadcast %cst_3 : f32 to vector<32x1xf32>
    %8 = arith.mulf %3, %7 : vector<32x1xf32>
    %cst_4 = arith.constant 3.906250e-03 : f32
    %9 = vector.broadcast %cst_4 : f32 to vector<32x1xf32>
    %10 = arith.mulf %6, %9 : vector<32x1xf32>
    %11 = arith.mulf %8, %8 : vector<32x1xf32>
    %12 = arith.subf %10, %11 : vector<32x1xf32>
    %cst_5 = arith.constant 0.000000e+00 : f32
    %13 = vector.broadcast %cst_5 : f32 to vector<32x1xf32>
    %14 = arith.maximumf %12, %13 : vector<32x1xf32>
    %cst_6 = arith.constant 9.99999974E-6 : f32
    %15 = vector.broadcast %cst_6 : f32 to vector<32x1xf32>
    %16 = arith.addf %14, %15 : vector<32x1xf32>
    %17 = math.rsqrt %16 : vector<32x1xf32>
    %c0_7 = arith.constant 0 : index
    %c0_8 = arith.constant 0 : index
    %18 = vector.load %arg2[%c0_7, %c0_8] : memref<32x1xf32, #tpu.memory_space<vmem>>, vector<32x1xf32>
    %c0_9 = arith.constant 0 : index
    %c0_10 = arith.constant 0 : index
    %19 = vector.load %arg3[%c0_9, %c0_10] : memref<32x1xf32, #tpu.memory_space<vmem>>, vector<32x1xf32>
    %20 = vector.broadcast %8 : vector<32x1xf32> to vector<32x256xf32>
    %21 = arith.subf %1, %20 : vector<32x256xf32>
    %22 = vector.broadcast %17 : vector<32x1xf32> to vector<32x256xf32>
    %23 = arith.mulf %21, %22 : vector<32x256xf32>
    %24 = arith.mulf %23, %23 : vector<32x256xf32>
    %cst_11 = arith.constant dense<0.000000e+00> : vector<256xf32>
    %25 = vector.multi_reduction <add>, %24, %cst_11 [0] : vector<32x256xf32> to vector<256xf32>
    %26 = vector.shape_cast %25 : vector<256xf32> to vector<1x256xf32>
    %cst_12 = arith.constant 1.000000e-24 : f32
    %27 = vector.broadcast %cst_12 : f32 to vector<1x256xf32>
    %28 = arith.maximumf %26, %27 : vector<1x256xf32>
    %29 = math.rsqrt %28 : vector<1x256xf32>
    %30 = vector.broadcast %8 : vector<32x1xf32> to vector<32x256xf32>
    %31 = arith.subf %1, %30 : vector<32x256xf32>
    %32 = arith.mulf %17, %18 : vector<32x1xf32>
    %33 = vector.broadcast %32 : vector<32x1xf32> to vector<32x256xf32>
    %34 = arith.mulf %31, %33 : vector<32x256xf32>
    %35 = vector.broadcast %29 : vector<1x256xf32> to vector<32x256xf32>
    %36 = arith.mulf %34, %35 : vector<32x256xf32>
    %37 = vector.broadcast %19 : vector<32x1xf32> to vector<32x256xf32>
    %38 = arith.addf %36, %37 : vector<32x256xf32>
    %c0_13 = arith.constant 0 : index
    %c0_14 = arith.constant 0 : index
    %c0_15 = arith.constant 0 : index
    %39 = vector.load %arg4[%c0_13, %c0_14, %c0_15] : memref<1x32x256xf32, #tpu.memory_space<vmem>>, vector<1x32x256xf32>
    %40 = vector.shape_cast %39 : vector<1x32x256xf32> to vector<32x256xf32>
    %41 = vector.shape_cast %38 : vector<32x256xf32> to vector<1x32x256xf32>
    tpu.vector_store %arg4[%c0_13, %c0_14, %c0_15], %41 {strides = array<i32>} : memref<1x32x256xf32, #tpu.memory_space<vmem>>, vector<1x32x256xf32>,
    return
  }
  func.func @transform_0(%arg0: i32) -> (i32, i32, i32) {
    %c0_i32 = arith.constant 0 : i32
    %c0_i32_0 = arith.constant 0 : i32
    %c0_i32_1 = arith.constant 0 : i32
    return %arg0, %c0_i32, %c0_i32_0 : i32, i32, i32
  }
  func.func @transform_1(%arg0: i32) -> (i32, i32) {
    %c0_i32 = arith.constant 0 : i32
    %c0_i32_0 = arith.constant 0 : i32
    %c0_i32_1 = arith.constant 0 : i32
    return %c0_i32, %c0_i32_0 : i32, i32
  }
  func.func @transform_2(%arg0: i32) -> (i32, i32) {
    %c0_i32 = arith.constant 0 : i32
    %c0_i32_0 = arith.constant 0 : i32
    %c0_i32_1 = arith.constant 0 : i32
    return %c0_i32, %c0_i32_0 : i32, i32
  }
  func.func @transform_3(%arg0: i32) -> (i32, i32, i32) {
    %c0_i32 = arith.constant 0 : i32
    %c0_i32_0 = arith.constant 0 : i32
    %c0_i32_1 = arith.constant 0 : i32
    return %arg0, %c0_i32, %c0_i32_0 : i32, i32, i32
  }
}

</mosaic_0001>

<bundles_post_ra>
// kernel: domain_norm2.1
= control target key start
LH: loop header
LB: loop body
LE: loop exit
PB: predicated region body
PF: predicated region fallthrough
CT: control target
= control target key end

     0   :  { %s489_s12 = smov 0   ;;  %s617_s0 = inlined_call_operand.vmem [shape: f32[2,32,256], index: 0, kind: input, shape index: {}]   ;;  %s618_s1 = inlined_call_operand.vmem [shape: f32[32,1], index: 1, kind: input, shape index: {}]   ;;  %s619_s2 = inlined_call_operand.vmem [shape: f32[32,1], index: 2, kind: input, shape index: {}]   ;;  %s620_s3 = inlined_call_operand.vmem [shape: f32[2,32,256], index: 3, kind: output, shape index: {}]  }
   0x1 LB: > { %s424_s13 = sadd.s32 4294967295, %s466_s12   ;;  %p428_p0 = scmp.ge.s32.totalorder %s466_s12, 1  ;;  %s466_s12 = sphi %s489_s12, %s13_s12  }
   0x2   : > { %p137_p1 = scmp.lt.s32.totalorder %s466_s12, 3 }
   0x4   : > { %p138_p2 = pnand %p428_p0, %p137_p1 }
   0x5   : > { %p161_p3 = scmp.lt.s32.totalorder (!%p138_p2), %s424_s13, 1 }
   0x6   : > { %141 = sbr.rel (%p138_p2) target bundleno = 327 (0x147), region = 32 }
   0xb   : > { %s622_s13 = smov (!%p161_p3, %s424_s13), 1  ;;  %v468_v24 = vmov 0   ;;  %v243_v25 = vld [vmem:[%s619_s2] sm:$0xff]  ;;  %v244_v26 = vld [vmem:[%s619_s2 + $0x8] sm:$0xff]  ;;  %v245_v27 = vld [vmem:[%s619_s2 + $0x10] sm:$0xff] }
   0xc   : > { %s435_s14 = sshll.u32 %s622_s13, 6  ;;  %447 = vset.pattern.permute.xlu1 %v468_v24  ;;  %446 = vset.pattern.permute.xlu0 %v468_v24  ;;  %v240_v60 = vld [vmem:[%s618_s1 + $0x8] sm:$0xff]  ;;  %v239_v61 = vld [vmem:[%s618_s1] sm:$0xff] }
   0xd   : > { %s165_s17 = scalar_lea.vmem %s617_s0, %s435_s14  ;;  %s170_s9 = scalar_lea.vmem %s620_s3, %s435_s14 }
   0xe   : > { %v505_v0 = vld [vmem:[%s165_s17 + $0x20] sm:$0xff]  ;;  %v507_v1 = vld [vmem:[%s165_s17 + $0x28] sm:$0xff]  ;;  %v515_v5 = vld [vmem:[%s165_s17 + $0x30] sm:$0xff] }
   0xf   : > { %v509_v2 = vld [vmem:[%s165_s17] sm:$0xff]  ;;  %v185_v3 = vadd.f32 %v507_v1, %v505_v0  ;;  %v513_v4 = vld [vmem:[%s165_s17 + $0x8] sm:$0xff]  ;;  %v517_v6 = vld [vmem:[%s165_s17 + $0x38] sm:$0xff]  ;;  %v197_v17 = vmul.f32 %v515_v5, %v515_v5  ;;  %v195_v20 = vmul.f32 %v505_v0, %v505_v0  ;;  %v196_v21 = vmul.f32 %v507_v1, %v507_v1 }
  0x10   : > { %v179_v7 = vadd.f32 %v513_v4, %v509_v2  ;;  %v521_v8 = vld [vmem:[%s165_s17 + $0x10] sm:$0xff]  ;;  %v523_v9 = vld [vmem:[%s165_s17 + $0x18] sm:$0xff]  ;;  %v188_v10 = vadd.f32 %v517_v6, %v515_v5  ;;  %v191_v14 = vmul.f32 %v509_v2, %v509_v2  ;;  %v192_v15 = vmul.f32 %v513_v4, %v513_v4 }
  0x11   : > { %186 = vadd.xlane.f32.xlu1 %v185_v3  ;;  %v193_v11 = vmul.f32 %v521_v8, %v521_v8  ;;  %v194_v12 = vmul.f32 %v523_v9, %v523_v9  ;;  %v182_v13 = vadd.f32 %v523_v9, %v521_v8  ;;  %v198_v18 = vmul.f32 %v517_v6, %v517_v6 }
  0x12   : > { %180 = vadd.xlane.f32.xlu0 %v179_v7  ;;  %v199_v19 = vadd.f32 %v192_v15, %v191_v14  ;;  %v205_v23 = vadd.f32 %v196_v21, %v195_v20 }
  0x13   : > { %v202_v16 = vadd.f32 %v194_v12, %v193_v11  ;;  %v208_v22 = vadd.f32 %v198_v18, %v197_v17 }
  0x15   : > { %189 = vadd.xlane.f32.xlu1 %v188_v10 }
  0x16   : > { %183 = vadd.xlane.f32.xlu0 %v182_v13 }
  0x19   : > { %203 = vadd.xlane.f32.xlu1 %v202_v16 }
  0x1a   : > { %200 = vadd.xlane.f32.xlu0 %v199_v19 }
  0x1d   : > { %209 = vadd.xlane.f32.xlu1 %v208_v22 }
  0x1e   : > { %206 = vadd.xlane.f32.xlu0 %v205_v23 }
  0x2e   : > { %335 = vperm.xlu1 %447, %v243_v25  }
  0x32   : > { %340 = vperm.xlu1 %447, %v244_v26   ;;  %v242_v26 = vld [vmem:[%s618_s1 + $0x18] sm:$0xff] }
  0x36   : > { %345 = vperm.xlu1 %447, %v245_v27  }
  0x9a   : > { %v187_v28 = vpop.xlane.xlu1 %186 }
  0x9b   : > { %v181_v29 = vpop.xlane.xlu0 %180  ;;  %v213_v39 = vmul.f32 0.00390625, %v187_v28 }
  0x9c   : > { %v211_v32 = vmul.f32 0.00390625, %v181_v29 }
  0x9d   : > { %v221_v50 = vmul.f32 %v213_v39, %v213_v39  ;;  %v586_v20 = vsub.f32 %v505_v0, %v213_v39  ;;  %v589_v21 = vsub.f32 %v507_v1, %v213_v39 }
  0x9e   : > { %v190_v30 = vpop.xlane.xlu1 %189  ;;  %v219_v40 = vmul.f32 %v211_v32, %v211_v32  ;;  %v567_v7 = vsub.f32 %v509_v2, %v211_v32  ;;  %v570_v10 = vsub.f32 %v513_v4, %v211_v32  ;;  %v241_v4 = vld [vmem:[%s618_s1 + $0x10] sm:$0xff] }
  0x9f   : > { %v184_v31 = vpop.xlane.xlu0 %183  ;;  %v214_v35 = vmul.f32 0.00390625, %v190_v30 }
  0xa0   : > { %v212_v33 = vmul.f32 0.00390625, %v184_v31 }
  0xa1   : > { %v222_v46 = vmul.f32 %v214_v35, %v214_v35  ;;  %v580_v2 = vsub.f32 %v517_v6, %v214_v35 }
  0xa2   : > { %v204_v34 = vpop.xlane.xlu1 %203  ;;  %v220_v37 = vmul.f32 %v212_v33, %v212_v33  ;;  %v561_v62 = vsub.f32 %v521_v8, %v212_v33  ;;  %v564_v63 = vsub.f32 %v523_v9, %v212_v33  ;;  %v577_v9 = vsub.f32 %v515_v5, %v214_v35 }
  0xa3   : > { %v216_v36 = vmul.f32 0.00390625, %v204_v34  ;;  %v201_v38 = vpop.xlane.xlu0 %200 }
  0xa4   : > { %v215_v41 = vmul.f32 0.00390625, %v201_v38  ;;  %v246_v38 = vld [vmem:[%s619_s2 + $0x18] sm:$0xff] }
  0xa5   : > { %v224_v42 = vsub.f32 %v216_v36, %v220_v37 }
  0xa6   : > { %v223_v43 = vsub.f32 %v215_v41, %v219_v40  ;;  %v210_v44 = vpop.xlane.xlu1 %209 }
  0xa7   : > { %v228_v45 = vmax.f32 %v224_v42, 0.0  ;;  %v218_v47 = vmul.f32 0.00390625, %v210_v44  ;;  %v207_v48 = vpop.xlane.xlu0 %206 }
  0xa8   : > { %v227_v49 = vmax.f32 %v223_v43, 0.0  ;;  %v217_v51 = vmul.f32 0.00390625, %v207_v48 }
  0xa9   : > { %v232_v52 = vadd.f32 1e-05, %v228_v45  ;;  %v226_v53 = vsub.f32 %v218_v47, %v222_v46 }
  0xaa   : > { %v231_v54 = vadd.f32 1e-05, %v227_v49  ;;  %v225_v55 = vsub.f32 %v217_v51, %v221_v50  ;;  %v336_v51 = vpop.permute.xlu1 %335 }
  0xab   : > { %448 = vrsqrt.f32 %v232_v52  ;;  %v230_v56 = vmax.f32 %v226_v53, 0.0 }
  0xac   : > { %450 = vrsqrt.f32 %v231_v54  ;;  %v229_v57 = vmax.f32 %v225_v55, 0.0 }
  0xad   : > { %v234_v58 = vadd.f32 1e-05, %v230_v56 }
  0xae   : > { %v233_v59 = vadd.f32 1e-05, %v229_v57  ;;  %v341_v54 = vpop.permute.xlu1 %340 }
  0xaf   : > { %452 = vrsqrt.f32 %v234_v58 }
  0xb0   : > { %454 = vrsqrt.f32 %v233_v59 }
  0xb2   : > { %v346_v55 = vpop.permute.xlu1 %345 }
  0xb8   : > { %v449_v3 = vpop.eup %448 }
  0xb9   : > { %v451_v11 = vpop.eup %450  ;;  %v294_v12 = vmul.f32 %v449_v3, %v240_v60  ;;  %v257_v13 = vmul.f32 %v449_v3, %v561_v62  ;;  %v258_v14 = vmul.f32 %v449_v3, %v564_v63 }
  0xba   : > { %v293_v15 = vmul.f32 %v451_v11, %v239_v61  ;;  %v255_v8 = vmul.f32 %v451_v11, %v567_v7  ;;  %v256_v16 = vmul.f32 %v451_v11, %v570_v10 }
  0xbb   : > { %304 = vperm.xlu1 %447, %v294_v12   ;;  %v265_v17 = vmul.f32 %v257_v13, %v257_v13  ;;  %v266_v18 = vmul.f32 %v258_v14, %v258_v14 }
  0xbc   : > { %v453_v19 = vpop.eup %452  ;;  %299 = vperm.xlu0 %446, %v293_v15   ;;  %v263_v5 = vmul.f32 %v255_v8, %v255_v8  ;;  %v264_v22 = vmul.f32 %v256_v16, %v256_v16 }
  0xbd   : > { %v455_v23 = vpop.eup %454  ;;  %v261_v6 = vmul.f32 %v453_v19, %v577_v9  ;;  %v262_v24 = vmul.f32 %v453_v19, %v580_v2  ;;  %v296_v31 = vmul.f32 %v453_v19, %v242_v26 }
  0xbe   : > { %v295_v25 = vmul.f32 %v455_v23, %v241_v4  ;;  %v259_v27 = vmul.f32 %v455_v23, %v586_v20  ;;  %v260_v0 = vmul.f32 %v455_v23, %v589_v21  ;;  %v271_v28 = vadd.f32 %v265_v17, %v263_v5 }
  0xbf   : > { %v280_v1 = vadd.f32 %v266_v18, %v264_v22  ;;  %v269_v32 = vmul.f32 %v261_v6, %v261_v6  ;;  %v270_v33 = vmul.f32 %v262_v24, %v262_v24 }
  0xc0   : > { %309 = vperm.xlu1 %447, %v295_v25   ;;  %v267_v29 = vmul.f32 %v259_v27, %v259_v27  ;;  %v268_v30 = vmul.f32 %v260_v0, %v260_v0 }
  0xc2   : > { %v272_v34 = vadd.f32 %v271_v28, %v267_v29  ;;  %v281_v35 = vadd.f32 %v280_v1, %v268_v30 }
  0xc4   : > { %314 = vperm.xlu1 %447, %v296_v31   ;;  %v273_v36 = vadd.f32 %v272_v34, %v269_v32  ;;  %v282_v37 = vadd.f32 %v281_v35, %v270_v33 }
  0xc6   : > { %v274_v39 = vrot.slane %v273_v36, 4  ;;  %v283_v40 = vrot.slane %v282_v37, 4 }
  0xc8   : > { %350 = vperm.xlu1 %447, %v246_v38   ;;  %v275_v41 = vadd.f32 %v274_v39, %v273_v36  ;;  %v284_v42 = vadd.f32 %v283_v40, %v282_v37 }
  0xca   : > { %v276_v43 = vrot.slane %v275_v41, 2  ;;  %v285_v44 = vrot.slane %v284_v42, 2 }
  0xcc   : > { %v277_v45 = vadd.f32 %v276_v43, %v275_v41  ;;  %v286_v46 = vadd.f32 %v285_v44, %v284_v42 }
  0xce   : > { %v278_v47 = vrot.slane %v277_v45, 1  ;;  %v287_v48 = vrot.slane %v286_v46, 1 }
  0xd0   : > { %v279_v49 = vadd.f32 %v278_v47, %v277_v45  ;;  %v288_v50 = vadd.f32 %v287_v48, %v286_v46 }
  0xd2   : > { %v289_v52 = vmax.f32 %v279_v49, 1e-24  ;;  %v290_v53 = vmax.f32 %v288_v50, 1e-24 }
  0xd4   : > { %456 = vrsqrt.f32 %v289_v52 }
  0xd5   : > { %458 = vrsqrt.f32 %v290_v53 }
  0xe1   : > { %v457_v57 = vpop.eup %456 }
  0xe2   : > { %v459_v61 = vpop.eup %458 }
 0x136   : > { %v305_v56 = vpop.permute.xlu1 %304 }
 0x137   : > { %v319_v58 = vmul.f32 %v305_v56, %v561_v62  ;;  %v320_v59 = vmul.f32 %v305_v56, %v564_v63  ;;  %v300_v60 = vpop.permute.xlu0 %299 }
 0x138   : > { %v317_v3 = vmul.f32 %v300_v60, %v567_v7  ;;  %v318_v11 = vmul.f32 %v300_v60, %v570_v10 }
 0x139   : > { %v327_v12 = vmul.f32 %v457_v57, %v319_v58  ;;  %v328_v13 = vmul.f32 %v459_v61, %v320_v59 }
 0x13a   : > { %v325_v14 = vmul.f32 %v457_v57, %v317_v3  ;;  %v326_v15 = vmul.f32 %v459_v61, %v318_v11 }
 0x13b   : > { %v355_v8 = vadd.f32 %v341_v54, %v327_v12  ;;  %v356_v16 = vadd.f32 %v341_v54, %v328_v13  ;;  %v310_v62 = vpop.permute.xlu1 %309 }
 0x13c   : > { %v353_v4 = vadd.f32 %v336_v51, %v325_v14  ;;  %v354_v63 = vadd.f32 %v336_v51, %v326_v15  ;;  %v321_v17 = vmul.f32 %v310_v62, %v586_v20  ;;  %v322_v7 = vmul.f32 %v310_v62, %v589_v21 }
 0x13d   : > { %363 = vst [vmem:[%s170_s9 + $0x10] sm:$0xff] %v355_v8  ;;  %364 = vst [vmem:[%s170_s9 + $0x18] sm:$0xff] %v356_v16 }
 0x13e   : > { %361 = vst [vmem:[%s170_s9] sm:$0xff] %v353_v4  ;;  %362 = vst [vmem:[%s170_s9 + $0x8] sm:$0xff] %v354_v63  ;;  %v329_v10 = vmul.f32 %v457_v57, %v321_v17  ;;  %v330_v18 = vmul.f32 %v459_v61, %v322_v7 }
 0x13f   : > { %v315_v19 = vpop.permute.xlu1 %314 }
 0x140   : > { %v357_v5 = vadd.f32 %v346_v55, %v329_v10  ;;  %v358_v22 = vadd.f32 %v346_v55, %v330_v18  ;;  %v323_v23 = vmul.f32 %v315_v19, %v577_v9  ;;  %v324_v6 = vmul.f32 %v315_v19, %v580_v2 }
 0x142   : > { %365 = vst [vmem:[%s170_s9 + $0x20] sm:$0xff] %v357_v5  ;;  %366 = vst [vmem:[%s170_s9 + $0x28] sm:$0xff] %v358_v22  ;;  %v331_v24 = vmul.f32 %v457_v57, %v323_v23  ;;  %v332_v25 = vmul.f32 %v459_v61, %v324_v6 }
 0x143   : > { %v351_v20 = vpop.permute.xlu1 %350 }
 0x144   : > { %v359_v26 = vadd.f32 %v351_v20, %v331_v24  ;;  %v360_v21 = vadd.f32 %v351_v20, %v332_v25 }
 0x146   : > { %367 = vst [vmem:[%s170_s9 + $0x30] sm:$0xff] %v359_v26  ;;  %368 = vst [vmem:[%s170_s9 + $0x38] sm:$0xff] %v360_v21 }
 0x147 PF: > { %s13_s12 = sadd.s32 1, %s466_s12  }
 0x148   : > { %p10_p4 = scmp.ge.s32.totalorder %s13_s12, 4  }
 0x14a   :  { %12 = sbr.rel (!%p10_p4) target bundleno = 1 (0x1), region = 62 }

</bundles_post_ra>
